<compile_context>
chip_gen: v7x
topology: tpu7x:2x2x1
jax: 0.10.0
libtpu: 0.0.40
codegen_flags: <defaults>
</compile_context>

<pallas_src>
import functools
import math

import jax
import jax.numpy as jnp
from jax.experimental import pallas as pl
from jax.experimental.pallas import tpu as pltpu


def _final_layer_kernel(x_ref, shift_ref, scale_ref, w_lin_ref, b_lin_ref,
                        o_ref, *, eps):
    """One grid step == one (batch, token-tile).

    x_ref     : (1, TILE_N, H)
    shift_ref : (1, 1, H)      precomputed shift for this batch element
    scale_ref : (1, 1, H)      precomputed scale for this batch element
    w_lin_ref : (H, Dout_pad)
    b_lin_ref : (1, Dout_pad)
    o_ref     : (1, TILE_N, Dout_pad)
    """
    x = x_ref[0].astype(jnp.float32)            # (TILE_N, H)
    shift = shift_ref[0].astype(jnp.float32)    # (1, H)
    scale = scale_ref[0].astype(jnp.float32)    # (1, H)

    # LayerNorm over last axis, no elementwise affine, PyTorch semantics:
    # biased variance, eps inside the rsqrt.  Stats in f32 (VPU/EUP).
    mean = jnp.mean(x, axis=-1, keepdims=True)
    var = jnp.mean(jnp.square(x - mean), axis=-1, keepdims=True)
    x_norm = (x - mean) * jax.lax.rsqrt(var + eps)

    # modulate: x * (1 + scale) + shift (broadcast over token axis)
    x_mod = x_norm * (1.0 + scale) + shift      # (TILE_N, H) f32

    # Final projection.  Feed MXU at the input dtype (bf16 stays bf16),
    # accumulate in f32.
    out = jnp.dot(x_mod.astype(x_ref.dtype), w_lin_ref[...],
                  preferred_element_type=jnp.float32)
    out = out + b_lin_ref[...].astype(jnp.float32)
    o_ref[0] = out.astype(o_ref.dtype)


def _pick_tile_n(n, target):
    """Largest divisor of n that is <= target and a multiple of 8 (or n)."""
    if n <= target:
        return n
    for t in range(target, 0, -1):
        if n % t == 0 and (t % 8 == 0 or t == n):
            return t
    return n


def final_layer_pallas(x, c, w_ada, b_ada, w_lin, b_lin, *, eps=1e-6,
                       tile_n=None):
    """x: (B, N, H), c: (B, H), w_ada: (H, 2H), w_lin: (H, Dout)."""
    B, N, H = x.shape
    Dout = w_lin.shape[1]

    # --- Hoisted AdaptiveLN: tiny M=1 matmul wastes MXU / VMEM in-kernel. ---
    silu_c = c * jax.nn.sigmoid(c)
    ada = silu_c @ w_ada + b_ada                       # (B, 2H)
    shift = ada[:, :H].astype(x.dtype).reshape(B, 1, H)
    scale = ada[:, H:].astype(x.dtype).reshape(B, 1, H)

    # --- Lane-dense output: pad Dout up to a multiple of 128 lanes. -------
    dout_pad = max(128, ((Dout + 127) // 128) * 128)
    if dout_pad != Dout:
        w_lin_p = jnp.zeros((H, dout_pad), w_lin.dtype).at[:, :Dout].set(w_lin)
        b_lin_p = jnp.zeros((dout_pad,), b_lin.dtype).at[:Dout].set(b_lin)
    else:
        w_lin_p, b_lin_p = w_lin, b_lin
    b_lin2 = b_lin_p.reshape(1, dout_pad)

    # --- Token-axis tiling (sized so double-buffered tiles fit 64 MiB). ---
    if tile_n is None:
        tile_n = 1024 if x.dtype == jnp.bfloat16 else 512
    tile_n = _pick_tile_n(N, tile_n)
    grid = (B, N // tile_n)

    kernel = functools.partial(_final_layer_kernel, eps=eps)

    out_padded = pl.pallas_call(
        kernel,
        out_shape=jax.ShapeDtypeStruct((B, N, dout_pad), x.dtype),
        grid_spec=pltpu.PrefetchScalarGridSpec(
            num_scalar_prefetch=0,
            grid=grid,
            in_specs=[
                pl.BlockSpec((1, tile_n, H), lambda b, n: (b, n, 0)),   # x
                pl.BlockSpec((1, 1, H), lambda b, n: (b, 0, 0)),        # shift
                pl.BlockSpec((1, 1, H), lambda b, n: (b, 0, 0)),        # scale
                pl.BlockSpec((H, dout_pad), lambda b, n: (0, 0)),       # w_lin
                pl.BlockSpec((1, dout_pad), lambda b, n: (0, 0)),       # b_lin
            ],
            out_specs=pl.BlockSpec((1, tile_n, dout_pad),
                                   lambda b, n: (b, n, 0)),
        ),
        compiler_params=pltpu.CompilerParams(
            dimension_semantics=("parallel", "parallel"),
            vmem_limit_bytes=64 * 1024 * 1024,
        ),
    )(x, shift, scale, w_lin_p, b_lin2)

    if dout_pad != Dout:
        return out_padded[..., :Dout]
    return out_padded


def final_layer_ref(x, c, w_ada, b_ada, w_lin, b_lin, *, eps=1e-6):
    """Pure-JAX reference matching the PyTorch forward."""
    silu_c = c * jax.nn.sigmoid(c)
    ada = silu_c @ w_ada + b_ada
    H = x.shape[-1]
    shift, scale = ada[:, :H], ada[:, H:]
    mean = jnp.mean(x, axis=-1, keepdims=True)
    var = jnp.mean(jnp.square(x - mean), axis=-1, keepdims=True)
    x_norm = (x - mean) * jax.lax.rsqrt(var + eps)
    x_mod = x_norm * (1.0 + scale[:, None, :]) + shift[:, None, :]
    return x_mod @ w_lin + b_lin


if __name__ == "__main__":
    # Small config consistent with the module: hidden=32, patch=2, out_ch=8.
    B, N, H = 2, 8, 32
    patch_size, out_channels = 2, 8
    Dout = patch_size * patch_size * out_channels  # 32
    eps = 1e-6

    key = jax.random.PRNGKey(0)
    kx, kc, kwa, kba, kwl, kbl = jax.random.split(key, 6)

    x = jax.random.normal(kx, (B, N, H), dtype=jnp.float32)
    c = jax.random.normal(kc, (B, H), dtype=jnp.float32)

    # AdaptiveLN linear: (in=H, out=2H) after transpose of PyTorch (2H, H).
    w_ada = jax.random.normal(kwa, (H, 2 * H), dtype=jnp.float32) * 0.02
    b_ada = jax.random.normal(kba, (2 * H,), dtype=jnp.float32) * 0.02
    # Final linear: (in=H, out=Dout) after transpose of PyTorch (Dout, H).
    w_lin = jax.random.normal(kwl, (H, Dout), dtype=jnp.float32) * 0.02
    b_lin = jax.random.normal(kbl, (Dout,), dtype=jnp.float32) * 0.02

    out = final_layer_pallas(x, c, w_ada, b_ada, w_lin, b_lin, eps=eps)
    out = jax.block_until_ready(out)

    ref = final_layer_ref(x, c, w_ada, b_ada, w_lin, b_lin, eps=eps)
    assert out.shape == (B, N, Dout), out.shape
    assert jnp.allclose(out, ref, atol=1e-5, rtol=1e-5), "mismatch vs reference"

    print("KERNEL_OK")
</pallas_src>

<mosaic_0001>
module attributes {stable_mosaic.version = 11 : i64} {
  func.func @_final_layer_kernel(%arg0: i32, %arg1: i32, %arg2: memref<1x8x32xf32, #tpu.memory_space<vmem>>, %arg3: memref<1x1x32xf32, #tpu.memory_space<vmem>>, %arg4: memref<1x1x32xf32, #tpu.memory_space<vmem>>, %arg5: memref<32x128xf32, #tpu.memory_space<vmem>>, %arg6: memref<1x128xf32, #tpu.memory_space<vmem>>, %arg7: memref<1x8x128xf32, #tpu.memory_space<vmem>>) attributes {dimension_semantics = [#tpu.dimension_semantics<parallel>, #tpu.dimension_semantics<parallel>], iteration_bounds = array<i64: 2, 1>, scalar_prefetch = 0 : i64, scratch_operands = 0 : i64, tpu.core_type = #tpu.core_type<tc>, window_params = [{transform_indices = @transform_0, window_bounds = array<i64: 1, 8, 32>}, {transform_indices = @transform_1, window_bounds = array<i64: 1, 1, 32>}, {transform_indices = @transform_2, window_bounds = array<i64: 1, 1, 32>}, {pipeline_mode = #tpu.pipeline_mode<synchronous>, transform_indices = @transform_3, window_bounds = array<i64: 32, 128>}, {pipeline_mode = #tpu.pipeline_mode<synchronous>, transform_indices = @transform_4, window_bounds = array<i64: 1, 128>}, {transform_indices = @transform_5, window_bounds = array<i64: 1, 8, 128>}]} {
    %c0 = arith.constant 0 : index
    %c0_0 = arith.constant 0 : index
    %c0_1 = arith.constant 0 : index
    %0 = vector.load %arg2[%c0, %c0_0, %c0_1] : memref<1x8x32xf32, #tpu.memory_space<vmem>>, vector<1x8x32xf32>
    %1 = vector.shape_cast %0 : vector<1x8x32xf32> to vector<8x32xf32>
    %c0_2 = arith.constant 0 : index
    %c0_3 = arith.constant 0 : index
    %c0_4 = arith.constant 0 : index
    %2 = vector.load %arg3[%c0_2, %c0_3, %c0_4] : memref<1x1x32xf32, #tpu.memory_space<vmem>>, vector<1x1x32xf32>
    %3 = vector.shape_cast %2 : vector<1x1x32xf32> to vector<1x32xf32>
    %c0_5 = arith.constant 0 : index
    %c0_6 = arith.constant 0 : index
    %c0_7 = arith.constant 0 : index
    %4 = vector.load %arg4[%c0_5, %c0_6, %c0_7] : memref<1x1x32xf32, #tpu.memory_space<vmem>>, vector<1x1x32xf32>
    %5 = vector.shape_cast %4 : vector<1x1x32xf32> to vector<1x32xf32>
    %cst = arith.constant dense<0.000000e+00> : vector<8xf32>
    %6 = vector.multi_reduction <add>, %1, %cst [1] : vector<8x32xf32> to vector<8xf32>
    %7 = vector.shape_cast %6 : vector<8xf32> to vector<8x1xf32>
    %cst_8 = arith.constant 3.200000e+01 : f32
    %8 = vector.broadcast %cst_8 : f32 to vector<8x1xf32>
    %9 = arith.divf %7, %8 : vector<8x1xf32>
    %10 = vector.broadcast %9 : vector<8x1xf32> to vector<8x32xf32>
    %11 = arith.subf %1, %10 : vector<8x32xf32>
    %12 = arith.mulf %11, %11 : vector<8x32xf32>
    %cst_9 = arith.constant dense<0.000000e+00> : vector<8xf32>
    %13 = vector.multi_reduction <add>, %12, %cst_9 [1] : vector<8x32xf32> to vector<8xf32>
    %14 = vector.shape_cast %13 : vector<8xf32> to vector<8x1xf32>
    %cst_10 = arith.constant 3.200000e+01 : f32
    %15 = vector.broadcast %cst_10 : f32 to vector<8x1xf32>
    %16 = arith.divf %14, %15 : vector<8x1xf32>
    %17 = vector.broadcast %9 : vector<8x1xf32> to vector<8x32xf32>
    %18 = arith.subf %1, %17 : vector<8x32xf32>
    %cst_11 = arith.constant 9.99999997E-7 : f32
    %19 = vector.broadcast %cst_11 : f32 to vector<8x1xf32>
    %20 = arith.addf %16, %19 : vector<8x1xf32>
    %21 = math.rsqrt %20 : vector<8x1xf32>
    %22 = vector.broadcast %21 : vector<8x1xf32> to vector<8x32xf32>
    %23 = arith.mulf %18, %22 : vector<8x32xf32>
    %cst_12 = arith.constant 1.000000e+00 : f32
    %24 = vector.broadcast %cst_12 : f32 to vector<1x32xf32>
    %25 = arith.addf %24, %5 : vector<1x32xf32>
    %26 = vector.broadcast %25 : vector<1x32xf32> to vector<8x32xf32>
    %27 = arith.mulf %23, %26 : vector<8x32xf32>
    %28 = vector.broadcast %3 : vector<1x32xf32> to vector<8x32xf32>
    %29 = arith.addf %27, %28 : vector<8x32xf32>
    %c0_13 = arith.constant 0 : index
    %c0_14 = arith.constant 0 : index
    %30 = vector.load %arg5[%c0_13, %c0_14] : memref<32x128xf32, #tpu.memory_space<vmem>>, vector<32x128xf32>
    %cst_15 = arith.constant dense<0.000000e+00> : vector<8x128xf32>
    %31 = tpu.matmul %29, %30, %cst_15 {dimension_numbers = #tpu.dot_dimension_numbers<[1], [0], [0], [1], [0, 0, 1, 1], [], []>} : vector<8x32xf32>, vector<32x128xf32>, vector<8x128xf32> -> vector<8x128xf32>
    %c0_16 = arith.constant 0 : index
    %c0_17 = arith.constant 0 : index
    %32 = vector.load %arg6[%c0_16, %c0_17] : memref<1x128xf32, #tpu.memory_space<vmem>>, vector<1x128xf32>
    %33 = vector.broadcast %32 : vector<1x128xf32> to vector<8x128xf32>
    %34 = arith.addf %31, %33 : vector<8x128xf32>
    %c0_18 = arith.constant 0 : index
    %c0_19 = arith.constant 0 : index
    %c0_20 = arith.constant 0 : index
    %35 = vector.load %arg7[%c0_18, %c0_19, %c0_20] : memref<1x8x128xf32, #tpu.memory_space<vmem>>, vector<1x8x128xf32>
    %36 = vector.shape_cast %35 : vector<1x8x128xf32> to vector<8x128xf32>
    %37 = vector.shape_cast %34 : vector<8x128xf32> to vector<1x8x128xf32>
    tpu.vector_store %arg7[%c0_18, %c0_19, %c0_20], %37 {strides = array<i32>} : memref<1x8x128xf32, #tpu.memory_space<vmem>>, vector<1x8x128xf32>,
    return
  }
  func.func @transform_0(%arg0: i32, %arg1: i32) -> (i32, i32, i32) {
    %c0_i32 = arith.constant 0 : i32
    %c0_i32_0 = arith.constant 0 : i32
    return %arg0, %arg1, %c0_i32 : i32, i32, i32
  }
  func.func @transform_1(%arg0: i32, %arg1: i32) -> (i32, i32, i32) {
    %c0_i32 = arith.constant 0 : i32
    %c0_i32_0 = arith.constant 0 : i32
    %c0_i32_1 = arith.constant 0 : i32
    return %arg0, %c0_i32, %c0_i32_0 : i32, i32, i32
  }
  func.func @transform_2(%arg0: i32, %arg1: i32) -> (i32, i32, i32) {
    %c0_i32 = arith.constant 0 : i32
    %c0_i32_0 = arith.constant 0 : i32
    %c0_i32_1 = arith.constant 0 : i32
    return %arg0, %c0_i32, %c0_i32_0 : i32, i32, i32
  }
  func.func @transform_3(%arg0: i32, %arg1: i32) -> (i32, i32) {
    %c0_i32 = arith.constant 0 : i32
    %c0_i32_0 = arith.constant 0 : i32
    %c0_i32_1 = arith.constant 0 : i32
    return %c0_i32, %c0_i32_0 : i32, i32
  }
  func.func @transform_4(%arg0: i32, %arg1: i32) -> (i32, i32) {
    %c0_i32 = arith.constant 0 : i32
    %c0_i32_0 = arith.constant 0 : i32
    %c0_i32_1 = arith.constant 0 : i32
    return %c0_i32, %c0_i32_0 : i32, i32
  }
  func.func @transform_5(%arg0: i32, %arg1: i32) -> (i32, i32, i32) {
    %c0_i32 = arith.constant 0 : i32
    %c0_i32_0 = arith.constant 0 : i32
    return %arg0, %arg1, %c0_i32 : i32, i32, i32
  }
}

</mosaic_0001>

<bundles_post_ra>
// kernel: tpu_custom_call.1
= control target key start
LH: loop header
LB: loop body
LE: loop exit
PB: predicated region body
PF: predicated region fallthrough
CT: control target
= control target key end

     0   :  { %s1351_s0 = inlined_call_operand.hbm [shape: f32[2,8,32], index: 0, kind: input, shape index: {}]   ;;  %s1352_s1 = inlined_call_operand.hbm [shape: f32[2,1,32], index: 1, kind: input, shape index: {}]   ;;  %s1353_s2 = inlined_call_operand.hbm [shape: f32[2,1,32], index: 2, kind: input, shape index: {}]   ;;  %s1354_s3 = inlined_call_operand.hbm [shape: f32[32,128], index: 3, kind: input, shape index: {}]   ;;  %s1355_s4 = inlined_call_operand.hbm [shape: f32[1,128], index: 4, kind: input, shape index: {}]   ;;  %s1356_s5 = inlined_call_operand.hbm [shape: f32[2,8,128], index: 5, kind: output, shape index: {}]  }
   0x1   :  { %1371 = sst [smem:[#allocation19_spill]] %s1352_s1 }
   0x2   :  { %1372 = sst [smem:[#allocation20_spill]] %s1354_s3 }
   0x3   :  { %10 = vsyncpa [#allocation3], 0 }
   0x4   :  { %12 = vsyncpa [#allocation3 + $0x1], 0 }
   0x5   :  { %13 = vsyncpa [#allocation6], 0 }
   0x6   :  { %15 = vsyncpa [#allocation6 + $0x1], 0 }
   0x7   :  { %16 = vsyncpa [#allocation9], 0 }
   0x8   :  { %17 = vsyncpa [#allocation4], 0 }
   0x9   :  { %19 = vsyncpa [#allocation4 + $0x1], 0  ;;  %s1041_s18 = smov 0   ;;  %s1043_s19 = smov 0  }
   0xa   :  { %s1045_s20 = smov 0   ;;  %s1047_s21 = smov 0  }
   0xb   :  { %s1049_s22 = smov 0   ;;  %s1051_s23 = smov 0  }
   0xc LB: > { %1373 = sst [smem:[#allocation16_spill]] %s986_s20  ;;  %s1072_s24 = sadd.s32 4294967295, %s998_s23   ;;  %s998_s23 = sphi %s1051_s23, %s25_s23   ;;  %s994_s22 = sphi %s1049_s22, %s1406_s22   ;;  %s990_s21 = sphi %s1047_s21, %s1405_s21   ;;  %s986_s20 = sphi %s1045_s20, %s1401_s20   ;;  %s982_s19 = sphi %s1043_s19, %s1404_s19   ;;  %s978_s18 = sphi %s1041_s18, %s1403_s18  }
   0xd   : > { %s619_s25 = sadd.s32 4294967294, %s998_s23   ;;  %p59_p0 = scmp.ne.s32.totalorder %s982_s19, %s978_s18 }
   0xe   : > { %p1357_p1 = scmp.eq.s32.totalorder %s1072_s24, 0  ;;  %p185_p3 = scmp.eq.s32.totalorder %s619_s25, 1 }
   0xf   : > { %p620_p5 = scmp.ge.s32.totalorder %s998_s23, 1  ;;  %p192_p7 = scmp.lt.s32.totalorder %s998_s23, 3 }
  0x10   : > { %p1081_p4 = por %p1357_p1, %p59_p0  ;;  %p1086_p6 = por %p185_p3, %p59_p0 }
  0x11   : > { %p1091_p8 = pnand %p620_p5, %p192_p7  ;;  %s1000_s29 = smov [#allocation8]  }
  0x12   : > { %s1374_s26 = scalar_select %p1081_p4, 1, 0 }
  0x13   : > { %s1375_s27 = scalar_select %p1086_p6, 1, 0 }
  0x14   : > { %s1376_s28 = scalar_select %p1091_p8, 1, 0 }
  0x15   : > { %s204_s30 = sshll.u32 %s1000_s29, 4  ;;  %p678_p9 = pneg %p1091_p8  ;;  %s205_s30 = int_to_ptr.vmem [resolvable:$true] %s204_s30 }
  0x16   : > { %s37_s7 = sadd.s32 1, %s994_s22  ;;  %s1378_s3 = sld [smem:[#allocation20_spill]] }
  0x17   : > { %p1100_p11 = pnand %p678_p9, %p1357_p1 }
  0x19   : > { %s1377_s6 = scalar_select %p1100_p11, 1, 0 }
  0x1a   : > { %p1362_p13 = pneg %p1100_p11 }
  0x1c   : > { %s762_s10 = scalar_lea.hbm %s1378_s3, 512 }
  0x1d   : > { %p763_p12 = scmp.ne.s32.totalorder %s1378_s3, %s762_s10  ;;  %p769_p5 = scmp.lt.u32.totalorder %s762_s10, %s1378_s3 }
  0x1f   : > { %p765_p0 = pnand %p1362_p13, %p763_p12 }
  0x21   : > { %p766_p3 = pneg %p765_p0 }
  0x23   : > { %p771_p7 = pnand %p769_p5, %p766_p3 }
  0x25   : > { %774 = shalt.err (!%p771_p7)
}
  0x26   : > { %s775_s15 = scalar_lea.vmem %s205_s30, 512  ;;  %p783_p2 = scmp.lt.s32.totalorder %s205_s30, %s205_s30 }
  0x27   : > { %p776_p9 = scmp.ne.s32.totalorder %s205_s30, %s775_s15  ;;  %p784_p6 = scmp.lt.s32.totalorder %s775_s15, %s775_s15 }
  0x29   : > { %p778_p10 = pnand %p776_p9, %p1362_p13  ;;  %p785_p4 = por %p784_p6, %p783_p2 }
  0x2b   : > { %p779_p1 = pneg %p778_p10 }
  0x2d   : > { %p786_p8 = pnand %p785_p4, %p779_p1 }
  0x2f   : > { %789 = shalt.err (!%p786_p8)
}
  0x30   : > { %s1001_s16 = smov 128   ;;  %s1002_s17 = smov 8  }
  0x31   : > { %681 = dma.hbm_to_vmem [thread:$0]  (!%p1100_p11), %s1378_s3, 512, %s205_s30, [#allocation9], %s1001_s16, %s1001_s16, %s1002_s17  }
  0x32   : > { %p39_p1 = scmp.ge.s32.totalorder %s37_s7, 2  ;;  %s46_s8 = sadd.s32 1, %s986_s20 }
  0x33   : > { %p53_p2 = scmp.ne.s32.totalorder %s986_s20, %s982_s19  ;;  %p54_p4 = scmp.eq.s32.totalorder %s998_s23, 0 }
  0x34   : > { %s1408_s7 = smov (%p39_p1, %s37_s7), 0  ;;  %p1380_p8 = scmp.eq.s32.totalorder %s1072_s24, 1 }
  0x35   : > { %1379 = sst [smem:[#allocation17_spill]] %s1408_s7  ;;  %p55_p6 = por %p54_p4, %p53_p2 }
  0x36   : > { %p1135_p10 = por %p1380_p8, %p53_p2  ;;  %s41_s10 = ssub.s32 %s994_s22, %s1408_s7 }
  0x37   : > { %p701_p12 = scmp.lt.s32.totalorder %s998_s23, 2  ;;  %p44_p0 = scmp.eq.s32.totalorder %s41_s10, 0 }
  0x38   : > { %s1381_s9 = scalar_select %p1135_p10, 1, 0 }
  0x39   : > { %s1143_s11 = sand.u32 1, %s986_s20   ;;  %p1145_p3 = pnand %p701_p12, %p55_p6 }
  0x3a   : > { %s248_s12 = sand.u32 1, %s998_s23   ;;  %s1360_s14 = sshll.u32 %s994_s22, 4 }
  0x3b   : > { %s1382_s30 = scalar_select %p1145_p3, 1, 0 }
  0x3c   : > { %s1151_s13 = scalar_select %p44_p0, %s986_s20, %s46_s8  }
  0x3d   : > { %s1384_s1 = sld [smem:[#allocation19_spill]]  ;;  %s251_s25 = scalar_lea.vmem [#allocation5], %s1143_s11 }
  0x3e   : > { %1383 = sst [smem:[#allocation18_spill]] %s1151_s13  ;;  %s258_s29 = sshll.u32 %s251_s25, 4  ;;  %s1162_s29 = int_to_ptr.vmem [resolvable:$true] %s258_s29 }
  0x3f   : > { %s1164_s10 = scalar_lea.sflag [#allocation6], %s248_s12  ;;  %p1170_p7 = pneg %p1145_p3 }
  0x41   : > { %s1385_s8 = scalar_select %p1170_p7, 1, 0 }
  0x43   : > { %s1159_s17 = scalar_lea.hbm %s1384_s1, %s1360_s14  ;;  %s795_s14 = scalar_lea.hbm %s1384_s1, 32 }
  0x44   : > { %s790_s3 = scalar_lea.hbm %s1159_s17, 16  ;;  %p796_p2 = scmp.lt.u32.totalorder %s1159_s17, %s1384_s1 }
  0x45   : > { %p791_p5 = scmp.ne.s32.totalorder %s1159_s17, %s790_s3  ;;  %p797_p4 = scmp.lt.u32.totalorder %s795_s14, %s790_s3 }
  0x46   : > { %p799_p8 = scmp.lt.u32.totalorder %s790_s3, %s1159_s17 }
  0x47   : > { %p793_p9 = pnand %p1170_p7, %p791_p5  ;;  %p798_p6 = por %p797_p4, %p796_p2 }
  0x49   : > { %p794_p1 = pneg %p793_p9  ;;  %p800_p12 = por %p799_p8, %p798_p6 }
  0x4b   : > { %p801_p0 = pnand %p800_p12, %p794_p1 }
  0x4d   : > { %804 = shalt.err (!%p801_p0)
}
  0x4e   : > { %s805_s12 = scalar_lea.vmem %s1162_s29, 16  ;;  %s1003_s15 = smov [#allocation5]  }
  0x4f   : > { %p806_p5 = scmp.ne.s32.totalorder %s1162_s29, %s805_s12  ;;  %s810_s16 = sshll.u32 %s1003_s15, 4  ;;  %s811_s16 = int_to_ptr.vmem [resolvable:$false] %s810_s16 }
  0x50   : > { %s812_s7 = scalar_lea.vmem %s811_s16, 32  ;;  %p813_p10 = scmp.lt.s32.totalorder %s1162_s29, %s811_s16 }
  0x51   : > { %p808_p9 = pnand %p806_p5, %p1170_p7  ;;  %p814_p11 = scmp.lt.s32.totalorder %s812_s7, %s805_s12 }
  0x53   : > { %p809_p13 = pneg %p808_p9  ;;  %p815_p2 = por %p814_p11, %p813_p10 }
  0x55   : > { %p816_p4 = pnand %p815_p2, %p809_p13 }
  0x57   : > { %819 = shalt.err (!%p816_p4)
}
  0x58   : > { %691 = dma.hbm_to_vmem [thread:$0]  (!%p1145_p3), %s1159_s17, 16, %s1162_s29, %s1164_s10  }
  0x59   : > { %s1004_s3 = smov [#allocation10]   ;;  %s624_s25 = sshll.u32 %s1143_s11, 3 }
  0x5a   : > { %s218_s14 = sshll.u32 %s1004_s3, 4  ;;  %s820_s16 = scalar_lea.hbm %s1355_s4, 16  ;;  %s219_s14 = int_to_ptr.vmem [resolvable:$true] %s218_s14 }
  0x5b   : > { %p821_p11 = scmp.ne.s32.totalorder %s1355_s4, %s820_s16  ;;  %p1386_p13 = scmp.ne.s32.totalorder %s1377_s6, 0 }
  0x5c   : > { %p827_p8 = scmp.lt.u32.totalorder %s820_s16, %s1355_s4 }
  0x5d   : > { %p1387_p10 = pneg %p1386_p13 }
  0x5f   : > { %p823_p1 = pnand %p821_p11, %p1387_p10 }
  0x61   : > { %p824_p6 = pneg %p823_p1 }
  0x63   : > { %p829_p12 = pnand %p827_p8, %p824_p6 }
  0x65   : > { %832 = shalt.err (!%p829_p12)
}
  0x66   : > { %s833_s17 = scalar_lea.vmem %s219_s14, 16  ;;  %p1388_p5 = pmov %p1387_p10 }
  0x67   : > { %p834_p0 = scmp.ne.s32.totalorder %s219_s14, %s833_s17  ;;  %s840_s1 = scalar_lea.vmem %s219_s14, 32 }
  0x68   : > { %p841_p4 = scmp.lt.s32.totalorder %s219_s14, %s219_s14  ;;  %p842_p3 = scmp.lt.s32.totalorder %s840_s1, %s833_s17 }
  0x69   : > { %p836_p9 = pnand %p834_p0, %p1388_p5 }
  0x6a   : > { %p843_p7 = por %p842_p3, %p841_p4 }
  0x6b   : > { %p837_p2 = pneg %p836_p9 }
  0x6d   : > { %p844_p10 = pnand %p843_p7, %p837_p2 }
  0x6f   : > { %847 = shalt.err (!%p844_p10)
}
  0x70   : > { %684 = dma.hbm_to_vmem [thread:$0]  (!%p1386_p13), %s1355_s4, 16, %s219_s14, [#allocation9]  }
  0x71   : > { %s625_s13 = sshll.u32 %s994_s22, 7  ;;  %s233_s3 = scalar_lea.vmem [#allocation2], %s624_s25 }
  0x72   : > { %s241_s15 = sshll.u32 %s233_s3, 4  ;;  %s1219_s7 = scalar_lea.hbm %s1351_s0, %s625_s13  ;;  %s242_s15 = int_to_ptr.vmem [resolvable:$true] %s241_s15 }
  0x73   : > { %s230_s6 = scalar_lea.sflag [#allocation3], %s1143_s11  ;;  %s848_s17 = scalar_lea.hbm %s1219_s7, 128 }
  0x74   : > { %p849_p3 = scmp.ne.s32.totalorder %s1219_s7, %s848_s17  ;;  %p1389_p7 = scmp.ne.s32.totalorder %s1385_s8, 0 }
  0x75   : > { %s853_s25 = scalar_lea.hbm %s1351_s0, 256  ;;  %p854_p13 = scmp.lt.u32.totalorder %s1219_s7, %s1351_s0 }
  0x76   : > { %p851_p11 = pnand %p849_p3, %p1389_p7  ;;  %p855_p6 = scmp.lt.u32.totalorder %s853_s25, %s848_s17 }
  0x77   : > { %p857_p12 = scmp.lt.u32.totalorder %s848_s17, %s1219_s7 }
  0x78   : > { %p852_p1 = pneg %p851_p11  ;;  %p856_p8 = por %p855_p6, %p854_p13 }
  0x7a   : > { %p858_p0 = por %p857_p12, %p856_p8 }
  0x7c   : > { %p859_p5 = pnand %p858_p0, %p852_p1 }
  0x7e   : > { %862 = shalt.err (!%p859_p5)
}
  0x7f   : > { %s863_s13 = scalar_lea.vmem %s242_s15, 128  ;;  %s1005_s3 = smov [#allocation2]  }
  0x80   : > { %p864_p9 = scmp.ne.s32.totalorder %s242_s15, %s863_s13  ;;  %s868_s16 = sshll.u32 %s1005_s3, 4  ;;  %s869_s16 = int_to_ptr.vmem [resolvable:$false] %s868_s16 }
  0x81   : > { %s870_s12 = scalar_lea.vmem %s869_s16, 256  ;;  %p871_p10 = scmp.lt.s32.totalorder %s242_s15, %s869_s16 }
  0x82   : > { %p866_p2 = pnand %p864_p9, %p1389_p7  ;;  %p872_p3 = scmp.lt.s32.totalorder %s870_s12, %s863_s13 }
  0x84   : > { %p867_p4 = pneg %p866_p2  ;;  %p873_p11 = por %p872_p3, %p871_p10 }
  0x86   : > { %p874_p6 = pnand %p873_p11, %p867_p4 }
  0x88   : > { %877 = shalt.err (!%p874_p6)
}
  0x89   : > { %p1390_p13 = scmp.ne.s32.totalorder %s1382_s30, 0  ;;  %s1391_s17 = sshll.u32 %s994_s22, 4 }
  0x8a   : > { %s1244_s25 = scalar_lea.hbm %s1353_s2, %s1391_s17  ;;  %s268_s29 = scalar_lea.vmem [#allocation7], %s1143_s11 }
  0x8b   : > { %688 = dma.hbm_to_vmem [thread:$0]  (!%p1390_p13), %s1219_s7, 128, %s242_s15, %s230_s6  }
  0x8c   : > { %s275_s20 = sshll.u32 %s268_s29, 4  ;;  %s878_s13 = scalar_lea.hbm %s1244_s25, 16  ;;  %s276_s20 = int_to_ptr.vmem [resolvable:$true] %s275_s20 }
  0x8d   : > { %p879_p1 = scmp.ne.s32.totalorder %s1244_s25, %s878_s13  ;;  %s883_s7 = scalar_lea.hbm %s1353_s2, 32 }
  0x8e   : > { %p884_p0 = scmp.lt.u32.totalorder %s1244_s25, %s1353_s2  ;;  %p885_p5 = scmp.lt.u32.totalorder %s883_s7, %s878_s13 }
  0x8f   : > { %p881_p8 = pnand %p879_p1, %p1389_p7  ;;  %p887_p2 = scmp.lt.u32.totalorder %s878_s13, %s1244_s25 }
  0x90   : > { %p886_p9 = por %p885_p5, %p884_p0 }
  0x91   : > { %p882_p12 = pneg %p881_p8 }
  0x92   : > { %p888_p4 = por %p887_p2, %p886_p9 }
  0x94   : > { %p889_p10 = pnand %p888_p4, %p882_p12 }
  0x96   : > { %892 = shalt.err (!%p889_p10)
}
  0x97   : > { %s893_s11 = scalar_lea.vmem %s276_s20, 16  ;;  %s1006_s12 = smov [#allocation7]  }
  0x98   : > { %p894_p3 = scmp.ne.s32.totalorder %s276_s20, %s893_s11  ;;  %s898_s17 = sshll.u32 %s1006_s12, 4  ;;  %s899_s17 = int_to_ptr.vmem [resolvable:$false] %s898_s17 }
  0x99   : > { %s900_s14 = scalar_lea.vmem %s899_s17, 32  ;;  %p901_p1 = scmp.lt.s32.totalorder %s276_s20, %s899_s17 }
  0x9a   : > { %p896_p11 = pnand %p894_p3, %p1389_p7  ;;  %p902_p8 = scmp.lt.s32.totalorder %s900_s14, %s893_s11 }
  0x9c   : > { %p897_p6 = pneg %p896_p11  ;;  %p903_p13 = por %p902_p8, %p901_p1 }
  0x9e   : > { %p904_p0 = pnand %p903_p13, %p897_p6 }
  0xa0   : > { %907 = shalt.err (!%p904_p0)
}
  0xa1   : > { %p1392_p5 = scmp.ne.s32.totalorder %s1382_s30, 0  ;;  %p1393_p12 = scmp.ne.s32.totalorder %s1376_s28, 0 }
  0xa2   : > { %s1268_s8 = sand.u32 (!%p1393_p12), 1, %s982_s19   ;;  %p1394_p7 = scmp.ne.s32.totalorder (!%p1393_p12), %s1374_s26, 0 }
  0xa3   : > { %694 = dma.hbm_to_vmem [thread:$0]  (!%p1392_p5), %s1244_s25, 16, %s276_s20, %s1164_s10  }
  0xa4   : > { %284 = sbr.rel (%p1393_p12) target bundleno = 720 (0x2d0), region = 40  ;;  %s629_s1 = sshll.u32 (!%p1393_p12), %s1268_s8, 3 }
  0xa5   : > { %s287_s29 = scalar_lea.sflag (!%p1393_p12), [#allocation3], %s1268_s8  ;;  %s290_s13 = scalar_lea.vmem (!%p1393_p12), [#allocation2], %s629_s1 }
  0xab   : > { %961 = dma.done.wait (%p1394_p7), %s287_s29, 128  }
  0xac   : > { %963 = vsyncadd (%p1394_p7), %s287_s29, 4294967168  ;;  %s295_s28 = sand.u32 1, %s1072_s24   ;;  %s298_s10 = scalar_lea.vmem [#allocation5], %s1268_s8 }
  0xad   : > { %s296_s30 = scalar_lea.sflag [#allocation6], %s295_s28 }
  0xae   : > { %965 = dma.done.wait (%p1394_p7), %s296_s30, 32  }
  0xaf   : > { %967 = vsyncadd (%p1394_p7), %s296_s30, 4294967264  ;;  %s306_s25 = scalar_lea.vmem [#allocation7], %s1268_s8  ;;  %p1395_p13 = scmp.eq.s32.totalorder %s1072_s24, 0 }
  0xb1   : > { %969 = dma.done.wait (%p1395_p13), [#allocation9], 528   ;;  %p1396_p9 = pmov %p1395_p13 }
  0xb2   : > { %vm352_vm0 = vcmask 261120   ;;  %v349_v0 = vld [vmem:[%s290_s13] sm:$0xff]  ;;  %v382_v7 = vld [vmem:[#allocation8] sm:$0xff]  ;;  %v1007_v10 = vmov 0.0|0.0   ;;  %vm1008_vm1 = vmmov 0   ;;  %v1009_v13 = vmov 0.0  }
  0xb3   : > { %971 = vsyncadd (%p1396_p9), [#allocation9], 4294966768  ;;  %v353_v1 = vsel %vm352_vm0, %v349_v0, 0.0  ;;  %v383_v8 = vld [vmem:[#allocation8 + $0x8] sm:$0xff]  ;;  %v384_v9 = vld [vmem:[#allocation8 + $0x10] sm:$0xff]  ;;  %656 = vmatprep.subr.bf16.mxu0 %v1007_v10  ;;  %653 = vmatprep.mubr.msk.f32.mxu0 %vm1008_vm1, %v1009_v13  ;;  %v369_v17 = vlaneseq  ;;  %s637_s24 = sshll.u32 %s990_s21, 7 }
  0xb4   : > { %354 = vadd.xlane.f32.xlu0 %v353_v1  ;;  %v657_v11 = vpack.c.bf16 %v383_v8, %v382_v7  ;;  %v385_v12 = vld [vmem:[#allocation8 + $0x18] sm:$0xff]  ;;  %v351_v20 = vld [vmem:[%s306_s25] sm:$0x1]  ;;  %v634_v29 = vld [vmem:[#allocation10] ss:$0 sm:$0xff]  ;;  %s348_s26 = scalar_lea.vmem [#allocation11], %s629_s1  ;;  %s1302_s7 = scalar_lea.hbm %s1356_s5, %s637_s24 }
  0xb5   : > { %v660_v14 = vpack.c.bf16 %v385_v12, %v384_v9  ;;  %v370_v19 = vshrl.u32 %v369_v17, 7  ;;  %v367_v21 = vadd.f32 1.0, %v351_v20  ;;  %v633_v26 = vld [vmem:[%s298_s10] ss:$0 sm:$0xff]  ;;  %s482_s20 = sshll.u32 %s348_s26, 4  ;;  %s468_s6 = scalar_lea.sflag [#allocation4], %s1268_s8  ;;  %s1304_s20 = int_to_ptr.vmem [resolvable:$true] %s482_s20 }
  0xb6   : > { %658 = vmatpush3.bf16.msra.mxu0 %v657_v11  ;;  %s908_s16 = scalar_lea.vmem %s1304_s20, 128  ;;  %p1397_p4 = scmp.ne.s32.totalorder %s1381_s9, 0 }
  0xb7   : > { %659 = vmatprep.subr.bf16.mxu0 %v1007_v10  ;;  %v371_v22 = vsub.s32 0, %v370_v19  ;;  %p909_p2 = scmp.ne.s32.totalorder %s1304_s20, %s908_s16  ;;  %s1010_s21 = smov [#allocation11]  }
  0xb8   : > { %s912_s11 = sshll.u32 %s1010_s21, 4  ;;  %s913_s11 = int_to_ptr.vmem [resolvable:$false] %s912_s11 }
  0xb9   : > { %v372_v23 = vrot.slane %v367_v21, %v371_v22  ;;  %p910_p10 = pnand %p909_p2, %p1397_p4  ;;  %s914_s12 = scalar_lea.vmem %s913_s11, 256 }
  0xba   : > { %661 = vmatpush3.bf16.msra.mxu0 %v660_v14  ;;  %p915_p11 = scmp.lt.s32.totalorder %s1304_s20, %s913_s11  ;;  %p916_p6 = scmp.lt.s32.totalorder %s914_s12, %s908_s16 }
  0xbb   : > { %p911_p3 = pneg %p910_p10 }
  0xbc   : > { %p917_p1 = por %p916_p6, %p915_p11 }
  0xbe   : > { %p918_p8 = pnand %p917_p1, %p911_p3 }
 0x141   : > { %v355_v2 = vpop.xlane.xlu0 %354 }
 0x142   : > { %v357_v3 = vmul.f32 0.03125, %v355_v2 }
 0x144   : > { %v358_v4 = vsub.f32 %v349_v0, %v357_v3 }
 0x146   : > { %v359_v5 = vmul.f32 %v358_v4, %v358_v4 }
 0x148   : > { %v360_v6 = vsel %vm352_vm0, %v359_v5, 0.0 }
 0x149   : > { %361 = vadd.xlane.f32.xlu0 %v360_v6 }
 0x1d6   : > { %v362_v15 = vpop.xlane.xlu0 %361 }
 0x1d7   : > { %v363_v16 = vmul.f32 0.03125, %v362_v15 }
 0x1d9   : > { %v364_v18 = vadd.f32 1e-06, %v363_v16 }
 0x1db   : > { %760 = vrsqrt.f32 %v364_v18 }
 0x1e5   : > { %v761_v24 = vpop.eup %760 }
 0x1e6   : > { %v366_v25 = vmul.f32 %v761_v24, %v358_v4 }
 0x1e8   : > { %v374_v27 = vmul.f32 %v372_v23, %v366_v25 }
 0x1ea   : > { %v381_v28 = vadd.f32 %v633_v26, %v374_v27 }
 0x1ec   : > { %654 = vmatmul.mubr.msk.f32.vlgmr.msra.gmra.mrb[0].mxu0 %vm352_vm0, %v381_v28 }
 0x2bf   : > { %v462_v30 = vpop.f32.mrb[0].mxu0 }
 0x2c0   : > { %v463_v31 = vadd.f32 %v634_v29, %v462_v30  ;;  %v655_v32 = vpop.f32.mrb[1].mxu0 }
 0x2c2   : > { %466 = vst [vmem:[%s348_s26] sm:$0xff] %v463_v31 }
 0x2c3   : > { %921 = shalt.err (!%p918_p8)
}
 0x2c4   : > { %s922_s17 = scalar_lea.hbm %s1302_s7, 128  ;;  %s926_s1 = scalar_lea.hbm %s1356_s5, 256 }
 0x2c5   : > { %p923_p0 = scmp.ne.s32.totalorder %s1302_s7, %s922_s17  ;;  %p927_p7 = scmp.lt.u32.totalorder %s1302_s7, %s1356_s5 }
 0x2c6   : > { %p928_p13 = scmp.lt.u32.totalorder %s926_s1, %s922_s17  ;;  %p930_p2 = scmp.lt.u32.totalorder %s922_s17, %s1302_s7 }
 0x2c7   : > { %p924_p5 = pnand %p923_p0, %p1397_p4 }
 0x2c8   : > { %p929_p9 = por %p928_p13, %p927_p7 }
 0x2c9   : > { %p925_p12 = pneg %p924_p5 }
 0x2ca   : > { %p931_p10 = por %p930_p2, %p929_p9 }
 0x2cc   : > { %p932_p3 = pnand %p931_p10, %p925_p12 }
 0x2ce   : > { %935 = shalt.err (!%p932_p3)
}
 0x2cf   : > { %676 = dma.vmem_to_hbm [thread:$0]  (%p1397_p4), %s1304_s20, 128, %s1302_s7, %s468_s6  }
 0x2d0 PF: > { %s494_s28 = sand.u32 1, %s978_s18   ;;  %p1398_p11 = scmp.ne.s32.totalorder %s1375_s27, 0 }
 0x2d1   : > { %p1399_p6 = scmp.ge.s32.totalorder %s998_s23, 2  ;;  %s495_s30 = scalar_lea.sflag [#allocation4], %s494_s28 }
 0x2d3   : > { %p696_p1 = pnand %p1399_p6, %p1398_p11 }
 0x2d5   : > { %973 = dma.done.wait (!%p696_p1), %s495_s30, 128  }
 0x2d6   : > { %975 = vsyncadd (!%p696_p1), %s495_s30, 4294967168  ;;  %s25_s23 = sadd.s32 1, %s998_s23   ;;  %s1400_s10 = sld [smem:[#allocation16_spill]] }
 0x2d7   : > { %p22_p8 = scmp.ge.s32.totalorder %s25_s23, 4   ;;  %s1401_s20 = sld [smem:[#allocation18_spill]] }
 0x2d8   : > { %s1402_s9 = sld [smem:[#allocation17_spill]]  ;;  %s1403_s18 = smov %s982_s19 }
 0x2d9   : > { %s1405_s21 = smov %s994_s22  ;;  %24 = sbr.rel (!%p22_p8) target bundleno = 12 (0xc), region = 117 }
 0x2dc   : > { %s1404_s19 = smov %s1400_s10 }
 0x2de   : > { %s1406_s22 = smov %s1402_s9 }
 0x2e0   :  { %500 = vsyncpa [#allocation3], 1 }
 0x2e1   :  { %502 = vsyncpa [#allocation3 + $0x1], 1 }
 0x2e2   :  { %503 = vsyncpa [#allocation6], 1 }
 0x2e3   :  { %505 = vsyncpa [#allocation6 + $0x1], 1 }
 0x2e4   :  { %506 = vsyncpa [#allocation9], 1 }
 0x2e5   :  { %507 = vsyncpa [#allocation4], 1 }
 0x2e6   :  { %509 = vsyncpa [#allocation4 + $0x1], 1 }

</bundles_post_ra>
